<compile_context>
chip_gen: v7x
topology: tpu7x:2x2x1
jax: 0.10.0
libtpu: 0.0.40
codegen_flags: <defaults>
</compile_context>

<pallas_src>
import functools

import jax
import jax.numpy as jnp
from jax.experimental import pallas as pl
from jax.experimental.pallas import tpu as pltpu


_VMEM_LIMIT_BYTES = 32 * 1024 * 1024   # explicit scoped-VMEM limit (safe on v5e/v6e/v7x)
_TILE_VMEM_BUDGET = 16 * 1024 * 1024   # budget for double-buffered x + output blocks
_MAX_TILE = 16384                      # hard cap on the pixel tile
_FUSE_MAX_PIXELS = 16384               # levels at/below this pixel count get one fused launch


def _rpn_head_kernel(x_ref, w_ref, b_ref, cls_ref, bbox_ref, *, num_anchors):
    # x_ref:    (C, TM)    channels x pixel tile (batch dim squeezed away)
    # w_ref:    (5A, C)    fused [cls ; bbox] 1x1-conv weights
    # b_ref:    (5A, 1)    fused bias
    # cls_ref:  (A, TM)    logits output tile (NCHW layout, lane-dense)
    # bbox_ref: (4A, TM)   bbox output tile
    out = jnp.dot(w_ref[...], x_ref[...],
                  preferred_element_type=jnp.float32) + b_ref[...]
    cls_ref[...] = out[:num_anchors].astype(cls_ref.dtype)
    bbox_ref[...] = out[num_anchors:].astype(bbox_ref.dtype)


def _pick_tile(m, n, c, a5, itemsize):
    """Largest pixel tile fitting the VMEM budget; keeps >= 2 grid steps."""
    per_pixel = 2 * (c + a5) * itemsize          # double-buffered input + output columns
    tm = (_TILE_VMEM_BUDGET // per_pixel) // 128 * 128
    tm = int(max(128, min(tm, _MAX_TILE)))
    if tm >= m:
        tm = m                                   # single full-extent block (always legal)
    # v7x has 2 TensorCores per chip: keep at least 2 grid steps when there is room.
    if n * pl.cdiv(m, tm) < 2 and m > 256:
        half = pl.cdiv(pl.cdiv(m, 2), 128) * 128
        tm = max(128, min(half, tm))
    return tm


def _rpn_head_flat_impl(x_flat, w_all, b_all, num_anchors):
    """Core kernel on a flattened (N, C, M) feature map -> (logits, bbox) flat."""
    n, c, m = x_flat.shape
    a5 = w_all.shape[0]
    a = num_anchors
    itemsize = jnp.dtype(x_flat.dtype).itemsize

    tm = _pick_tile(m, n, c, a5, itemsize)
    grid = (n, pl.cdiv(m, tm))

    kernel = functools.partial(_rpn_head_kernel, num_anchors=a)

    logits, bbox = pl.pallas_call(
        kernel,
        out_shape=(
            jax.ShapeDtypeStruct((n, a, m), x_flat.dtype),
            jax.ShapeDtypeStruct((n, a5 - a, m), x_flat.dtype),
        ),
        grid=grid,
        in_specs=[
            pl.BlockSpec((pl.Squeezed(), c, tm), lambda ni, mi: (ni, 0, mi)),
            pl.BlockSpec((a5, c), lambda ni, mi: (0, 0)),
            pl.BlockSpec((a5, 1), lambda ni, mi: (0, 0)),
        ],
        out_specs=(
            pl.BlockSpec((pl.Squeezed(), a, tm), lambda ni, mi: (ni, 0, mi)),
            pl.BlockSpec((pl.Squeezed(), a5 - a, tm), lambda ni, mi: (ni, 0, mi)),
        ),
        compiler_params=pltpu.CompilerParams(
            dimension_semantics=("parallel", "parallel"),
            vmem_limit_bytes=_VMEM_LIMIT_BYTES),
        cost_estimate=pl.CostEstimate(
            flops=2 * n * m * c * a5,
            transcendentals=0,
            bytes_accessed=itemsize * (n * c * m + a5 * c + a5 + n * a5 * m)),
    )(x_flat, w_all, b_all)
    return logits, bbox


@functools.partial(jax.jit, static_argnames=("num_anchors",))
def _rpn_head_flat(x_flat, w_all, b_all, *, num_anchors):
    return _rpn_head_flat_impl(x_flat, w_all, b_all, num_anchors)


@functools.partial(jax.jit, static_argnames=("num_anchors",))
def _rpn_head_single(x_nchw, w_all, b_all, *, num_anchors):
    """One NCHW feature map -> (logits, bbox) in NCHW (free reshapes only)."""
    n, c, h, w = x_nchw.shape
    lg, bb = _rpn_head_flat_impl(x_nchw.reshape(n, c, h * w), w_all, b_all, num_anchors)
    return (lg.reshape(n, num_anchors, h, w),
            bb.reshape(n, 4 * num_anchors, h, w))


class RPNHeadConvRegressorPallas:
    """JAX/Pallas port of RPNHeadConvRegressor (1x1 conv cls + bbox heads)."""

    def __init__(self, key, in_channels, num_anchors, dtype=jnp.float32):
        k1, k2 = jax.random.split(key)
        self.num_anchors = num_anchors
        # PyTorch conv weight is (out, in, 1, 1); in the W @ x orientation it
        # is just (out, in).  Init: normal(std=0.01), zero bias (per spec).
        self.w_cls = (0.01 * jax.random.normal(
            k1, (num_anchors, in_channels))).astype(dtype)
        self.w_bbox = (0.01 * jax.random.normal(
            k2, (num_anchors * 4, in_channels))).astype(dtype)
        self.b_cls = jnp.zeros((num_anchors, 1), dtype=jnp.float32)
        self.b_bbox = jnp.zeros((num_anchors * 4, 1), dtype=jnp.float32)
        # Fused weights / bias for the single-matmul kernel.
        self.w_all = jnp.concatenate([self.w_cls, self.w_bbox], axis=0)
        self.b_all = jnp.concatenate([self.b_cls, self.b_bbox], axis=0)

    def __call__(self, x):
        assert isinstance(x, (list, tuple)) and len(x) > 0
        n, c = x[0].shape[0], x[0].shape[1]
        for y in x:
            assert y.shape[0] == n and y.shape[1] == c
        a = self.num_anchors

        results = [None] * len(x)
        small, large = [], []
        for i, y in enumerate(x):
            (small if y.shape[2] * y.shape[3] <= _FUSE_MAX_PIXELS else large).append(i)

        # Large levels: one launch each (no extra input copy for concatenation).
        for i in large:
            results[i] = _rpn_head_single(x[i], self.w_all, self.b_all,
                                          num_anchors=a)

        # Small levels: concatenate flattened pixel axes and launch once.
        if len(small) == 1:
            i = small[0]
            results[i] = _rpn_head_single(x[i], self.w_all, self.b_all,
                                          num_anchors=a)
        elif small:
            ms = [x[i].shape[2] * x[i].shape[3] for i in small]
            x_cat = jnp.concatenate(
                [x[i].reshape(n, c, -1) for i in small], axis=-1)
            lg_cat, bb_cat = _rpn_head_flat(x_cat, self.w_all, self.b_all,
                                            num_anchors=a)
            off = 0
            for i, m in zip(small, ms):
                h, w = x[i].shape[2], x[i].shape[3]
                results[i] = (lg_cat[:, :, off:off + m].reshape(n, a, h, w),
                              bb_cat[:, :, off:off + m].reshape(n, 4 * a, h, w))
                off += m

        logits = [r[0] for r in results]
        bbox_reg = [r[1] for r in results]
        return logits, bbox_reg


if __name__ == "__main__":
    key = jax.random.PRNGKey(0)
    k_param, k_b1, k_b2, k_x0, k_x1 = jax.random.split(key, 5)

    in_channels = 4
    num_anchors = 3
    head = RPNHeadConvRegressorPallas(k_param, in_channels, num_anchors)

    # Exercise the bias-add path (module init is zero per the PyTorch spec,
    # so override it with nonzero values for the test only).
    head.b_cls = 0.1 * jax.random.normal(k_b1, (num_anchors, 1), dtype=jnp.float32)
    head.b_bbox = 0.1 * jax.random.normal(k_b2, (num_anchors * 4, 1), dtype=jnp.float32)
    head.b_all = jnp.concatenate([head.b_cls, head.b_bbox], axis=0)

    # Two feature-map levels (list input), NCHW.
    x0 = jax.random.normal(k_x0, (2, in_channels, 16, 16), dtype=jnp.float32)
    x1 = jax.random.normal(k_x1, (2, in_channels, 8, 8), dtype=jnp.float32)
    feats = [x0, x1]

    logits, bbox_reg = head(feats)       # fused multi-level launch path
    logits1, bbox1 = head([x0])          # single-level launch path
    jax.block_until_ready((logits, bbox_reg, logits1, bbox1))

    # Reference check against plain-JAX 1x1 conv (channel einsum + bias, f32 exact).
    hp = jax.lax.Precision.HIGHEST

    def ref(y):
        rlg = (jnp.einsum("nchw,ac->nahw", y, head.w_cls, precision=hp)
               + head.b_cls.reshape(1, num_anchors, 1, 1))
        rbb = (jnp.einsum("nchw,ac->nahw", y, head.w_bbox, precision=hp)
               + head.b_bbox.reshape(1, num_anchors * 4, 1, 1))
        return rlg, rbb

    for y, lg, bb in zip(feats, logits, bbox_reg):
        rlg, rbb = ref(y)
        assert lg.shape == (y.shape[0], num_anchors, y.shape[2], y.shape[3])
        assert bb.shape == (y.shape[0], num_anchors * 4, y.shape[2], y.shape[3])
        assert jnp.allclose(lg, rlg, atol=1e-4, rtol=1e-4)
        assert jnp.allclose(bb, rbb, atol=1e-4, rtol=1e-4)

    rlg0, rbb0 = ref(x0)
    assert jnp.allclose(logits1[0], rlg0, atol=1e-4, rtol=1e-4)
    assert jnp.allclose(bbox1[0], rbb0, atol=1e-4, rtol=1e-4)

    print("KERNEL_OK")
</pallas_src>

<mosaic_0001>
module attributes {stable_mosaic.version = 11 : i64} {
  func.func @_rpn_head_kernel(%arg0: i32, %arg1: i32, %arg2: memref<1x4x320xf32, #tpu.memory_space<vmem>>, %arg3: memref<15x4xf32, #tpu.memory_space<vmem>>, %arg4: memref<15x1xf32, #tpu.memory_space<vmem>>, %arg5: memref<1x3x320xf32, #tpu.memory_space<vmem>>, %arg6: memref<1x12x320xf32, #tpu.memory_space<vmem>>) attributes {dimension_semantics = [#tpu.dimension_semantics<parallel>, #tpu.dimension_semantics<parallel>], iteration_bounds = array<i64: 2, 1>, scalar_prefetch = 0 : i64, scratch_operands = 0 : i64, tpu.core_type = #tpu.core_type<tc>, window_params = [{transform_indices = @transform_0, window_bounds = array<i64: 1, 4, 320>}, {pipeline_mode = #tpu.pipeline_mode<synchronous>, transform_indices = @transform_1, window_bounds = array<i64: 15, 4>}, {pipeline_mode = #tpu.pipeline_mode<synchronous>, transform_indices = @transform_2, window_bounds = array<i64: 15, 1>}, {transform_indices = @transform_3, window_bounds = array<i64: 1, 3, 320>}, {transform_indices = @transform_4, window_bounds = array<i64: 1, 12, 320>}]} {
    %c0 = arith.constant 0 : index
    %c0_0 = arith.constant 0 : index
    %0 = vector.load %arg3[%c0, %c0_0] : memref<15x4xf32, #tpu.memory_space<vmem>>, vector<15x4xf32>
    %c0_1 = arith.constant 0 : index
    %c0_2 = arith.constant 0 : index
    %c0_3 = arith.constant 0 : index
    %1 = vector.load %arg2[%c0_1, %c0_2, %c0_3] : memref<1x4x320xf32, #tpu.memory_space<vmem>>, vector<1x4x320xf32>
    %2 = vector.shape_cast %1 : vector<1x4x320xf32> to vector<4x320xf32>
    %cst = arith.constant dense<0.000000e+00> : vector<15x320xf32>
    %3 = tpu.matmul %0, %2, %cst {dimension_numbers = #tpu.dot_dimension_numbers<[1], [0], [0], [1], [0, 0, 1, 1], [], []>} : vector<15x4xf32>, vector<4x320xf32>, vector<15x320xf32> -> vector<15x320xf32>
    %c0_4 = arith.constant 0 : index
    %c0_5 = arith.constant 0 : index
    %4 = vector.load %arg4[%c0_4, %c0_5] : memref<15x1xf32, #tpu.memory_space<vmem>>, vector<15x1xf32>
    %5 = vector.broadcast %4 : vector<15x1xf32> to vector<15x320xf32>
    %6 = arith.addf %3, %5 : vector<15x320xf32>
    %7 = vector.extract_strided_slice %6 {offsets = [0, 0], sizes = [3, 320], strides = [1, 1]} : vector<15x320xf32> to vector<3x320xf32>
    %c0_6 = arith.constant 0 : index
    %c0_7 = arith.constant 0 : index
    %c0_8 = arith.constant 0 : index
    %8 = vector.load %arg5[%c0_6, %c0_7, %c0_8] : memref<1x3x320xf32, #tpu.memory_space<vmem>>, vector<1x3x320xf32>
    %9 = vector.shape_cast %8 : vector<1x3x320xf32> to vector<3x320xf32>
    %10 = vector.shape_cast %7 : vector<3x320xf32> to vector<1x3x320xf32>
    tpu.vector_store %arg5[%c0_6, %c0_7, %c0_8], %10 {strides = array<i32>} : memref<1x3x320xf32, #tpu.memory_space<vmem>>, vector<1x3x320xf32>,
    %11 = vector.extract_strided_slice %6 {offsets = [3, 0], sizes = [12, 320], strides = [1, 1]} : vector<15x320xf32> to vector<12x320xf32>
    %c0_9 = arith.constant 0 : index
    %c0_10 = arith.constant 0 : index
    %c0_11 = arith.constant 0 : index
    %12 = vector.load %arg6[%c0_9, %c0_10, %c0_11] : memref<1x12x320xf32, #tpu.memory_space<vmem>>, vector<1x12x320xf32>
    %13 = vector.shape_cast %12 : vector<1x12x320xf32> to vector<12x320xf32>
    %14 = vector.shape_cast %11 : vector<12x320xf32> to vector<1x12x320xf32>
    tpu.vector_store %arg6[%c0_9, %c0_10, %c0_11], %14 {strides = array<i32>} : memref<1x12x320xf32, #tpu.memory_space<vmem>>, vector<1x12x320xf32>,
    return
  }
  func.func @transform_0(%arg0: i32, %arg1: i32) -> (i32, i32, i32) {
    %c0_i32 = arith.constant 0 : i32
    %c0_i32_0 = arith.constant 0 : i32
    return %arg0, %c0_i32, %arg1 : i32, i32, i32
  }
  func.func @transform_1(%arg0: i32, %arg1: i32) -> (i32, i32) {
    %c0_i32 = arith.constant 0 : i32
    %c0_i32_0 = arith.constant 0 : i32
    %c0_i32_1 = arith.constant 0 : i32
    return %c0_i32, %c0_i32_0 : i32, i32
  }
  func.func @transform_2(%arg0: i32, %arg1: i32) -> (i32, i32) {
    %c0_i32 = arith.constant 0 : i32
    %c0_i32_0 = arith.constant 0 : i32
    %c0_i32_1 = arith.constant 0 : i32
    return %c0_i32, %c0_i32_0 : i32, i32
  }
  func.func @transform_3(%arg0: i32, %arg1: i32) -> (i32, i32, i32) {
    %c0_i32 = arith.constant 0 : i32
    %c0_i32_0 = arith.constant 0 : i32
    return %arg0, %c0_i32, %arg1 : i32, i32, i32
  }
  func.func @transform_4(%arg0: i32, %arg1: i32) -> (i32, i32, i32) {
    %c0_i32 = arith.constant 0 : i32
    %c0_i32_0 = arith.constant 0 : i32
    return %arg0, %c0_i32, %arg1 : i32, i32, i32
  }
}

</mosaic_0001>

<bundles_post_ra>
// kernel: _rpn_head_flat.1
= control target key start
LH: loop header
LB: loop body
LE: loop exit
PB: predicated region body
PF: predicated region fallthrough
CT: control target
= control target key end

     0   :  { %s724_s15 = smov 0   ;;  %s726_s16 = smov 0   ;;  %s783_s0 = inlined_call_operand.vmem [shape: f32[2,4,320], index: 0, kind: input, shape index: {}]   ;;  %s784_s1 = inlined_call_operand.vmem [shape: f32[15,4], index: 1, kind: input, shape index: {}]   ;;  %s785_s2 = inlined_call_operand.vmem [shape: f32[15,1], index: 2, kind: input, shape index: {}]   ;;  %s786_s3 = inlined_call_operand.vmem [shape: f32[2,3,320], index: 3, kind: output, shape index: {0}]   ;;  %s787_s4 = inlined_call_operand.vmem [shape: f32[2,12,320], index: 4, kind: output, shape index: {1}]  }
   0x1   :  { %s728_s17 = smov 0  }
   0x2 LB: > { %s27_s18 = sadd.s32 1, %s691_s16  ;;  %p622_p0 = scmp.ge.s32.totalorder %s695_s17, 1  ;;  %s695_s17 = sphi %s728_s17, %s15_s17   ;;  %s691_s16 = sphi %s726_s16, %s789_s16   ;;  %s687_s15 = sphi %s724_s15, %s788_s15  }
   0x3   : > { %p29_p1 = scmp.ge.s32.totalorder %s27_s18, 2  ;;  %p188_p2 = scmp.lt.s32.totalorder %s695_s17, 3 }
   0x5   : > { %s791_s18 = smov (%p29_p1, %s27_s18), 0  ;;  %p189_p3 = pnand %p622_p0, %p188_p2 }
   0x6   : > { %p232_p4 = scmp.lt.s32.totalorder (!%p189_p3), %s687_s15, 1  ;;  %v261_v0 = vld [vmem:[%s784_s1] sm:$0xff] (!%p189_p3)  ;;  %vm280_vm0 = vcmask (!%p189_p3), 31744   ;;  %v697_v1 = vmov (!%p189_p3), 0.0   ;;  %v698_v3 = vmov (!%p189_p3), 0   ;;  %vm287_vm1 = vcmask (!%p189_p3), 1043456  }
   0x7   : > { %192 = sbr.rel (%p189_p3) target bundleno = 246 (0xf6), region = 32  ;;  %358 = vmatprep.mubr.f32.mxu0 (!%p189_p3), %v697_v1  ;;  %640 = vmatprep.mubr.msk.f32.mxu1 (!%p189_p3), %vm280_vm0, %v261_v0  ;;  %v265_v2 = vld [vmem:[%s785_s2] sm:$0xff] (!%p189_p3)  ;;  %v266_v4 = vld [vmem:[%s785_s2 + $0x8] sm:$0x7f] (!%p189_p3)  ;;  %vm452_vm2 = vcmask (!%p189_p3), 518144   ;;  %vm479_vm3 = vcmask (!%p189_p3), 519168  }
   0x8   : > { %671 = vset.pattern.permute.xlu0 (!%p189_p3), %v698_v3  ;;  %v262_v7 = vld [vmem:[%s784_s1 + $0x8] sm:$0x7f] (!%p189_p3)  ;;  %vm457_vm4 = vcmask (!%p189_p3), 1044480   ;;  %vm475_vm5 = vcmask (!%p189_p3), 523264  }
   0x9   : > { %269 = vperm.xlu0 (!%p189_p3), %671, %v265_v2  }
   0xd   : > { %274 = vperm.xlu0 (!%p189_p3), %671, %v266_v4  }
   0xe   : > { %s793_s15 = smov (!%p232_p4, %s687_s15), 1 }
   0xf   : > { %s643_s23 = smul.u32 12, %s793_s15 }
  0x10   : > { %s644_s5 = smul.u32 48, %s793_s15 }
  0x11   : > { %s239_s28 = scalar_lea.vmem %s783_s0, %s643_s23  ;;  %s249_s8 = scalar_lea.vmem %s786_s3, %s643_s23 }
  0x12   : > { %v263_v5 = vld [vmem:[%s239_s28] sm:$0xff]  ;;  %v264_v6 = vld [vmem:[%s239_s28 + $0x8] sm:$0xf]  ;;  %s259_s11 = scalar_lea.vmem %s787_s4, %s644_s5 }
  0x13   : > { %v279_v8 = vcombine.high %v263_v5, %v263_v5  ;;  %638 = vmatprep.subr.msk.mxu1 %vm287_vm1, %v264_v6 }
  0x14   : > { %639 = vmatpush3.msk.msra.mxu1 %vm287_vm1, %v264_v6 }
  0x15   : > { %626 = vmatprep.subr.msk.mxu0 %vm287_vm1, %v279_v8  ;;  %641 = vmatmul.mubr.msk.f32.vlgmr.msra.gmra.mrb[0].mxu1 %vm280_vm0, %v262_v7 }
  0x16   : > { %627 = vmatpush1.msk.msra.mxu0 %vm287_vm1, %v263_v5 }
  0x17   : > { %628 = vmatmul.mubr.msk.f32.vlgmr.msra.gmra.mrb[0].mxu0 %vm280_vm0, %v261_v0 }
  0x18   : > { %364 = vmatprep.mubr.f32.mxu0 %v697_v1 }
  0x1b   : > { %629 = vmatmul.mubr.msk.f32.gmra.mrb[2].mxu0 %vm280_vm0, %v262_v7 }
  0x88   : > { %v270_v9 = vpop.permute.xlu0 %269 }
  0x8c   : > { %v275_v10 = vpop.permute.xlu0 %274 }
  0xe8   : > { %v642_v11 = vpop.f32.mrb[0].mxu1 }
  0xe9   : > { %v443_v12 = vadd.f32 %v642_v11, %v275_v10  ;;  %v437_v13 = vpop.f32.mrb[1].mxu1 }
  0xea   : > { %v360_v14 = vpop.f32.mrb[0].mxu0  ;;  %v438_v15 = vadd.f32 %v437_v13, %v270_v9 }
  0xeb   : > { %v361_v16 = vadd.f32 %v360_v14, %v270_v9  ;;  %v465_v17 = vrot.slane %v443_v12, 3  ;;  %v362_v18 = vpop.f32.mrb[1].mxu0 }
  0xec   : > { %v363_v19 = vadd.f32 %v362_v18, %v270_v9  ;;  %453 = vst.msk [vmem:[%s249_s8 + $0x8] sm:$0x7] %vm452_vm2, %v438_v15  ;;  %v464_v20 = vrot.slane %v438_v15, 3 }
  0xed   : > { %480 = vst.msk [vmem:[%s259_s11 + $0x28] sm:$0xf] %vm479_vm3, %v465_v17  ;;  %v458_v27 = vrot.slane %v361_v16, 3 }
  0xee   : > { %v449_v21 = vcombine.low %v361_v16, %v363_v19  ;;  %v466_v22 = vsel %vm457_vm4, %v464_v20, %v465_v17  ;;  %v366_v23 = vpop.f32.mrb[2].mxu0  ;;  %v461_v29 = vrot.slane %v363_v19, 3 }
  0xef   : > { %476 = vst.msk [vmem:[%s259_s11 + $0x10] sm:$0xff] %vm475_vm5, %v466_v22  ;;  %v367_v24 = vadd.f32 %v366_v23, %v275_v10  ;;  %v368_v25 = vpop.f32.mrb[3].mxu0 }
  0xf0   : > { %451 = vst [vmem:[%s249_s8] sm:$0x77] %v449_v21  ;;  %v369_v26 = vadd.f32 %v368_v25, %v275_v10 }
  0xf1   : > { %v459_v28 = vrot.slane %v367_v24, 3 }
  0xf2   : > { %v462_v30 = vrot.slane %v369_v26, 3 }
  0xf3   : > { %v460_v31 = vsel %vm457_vm4, %v458_v27, %v459_v28  ;;  %477 = vst [vmem:[%s259_s11 + $0x18] sm:$0xf] %v459_v28 }
  0xf4   : > { %473 = vst [vmem:[%s259_s11] sm:$0xff] %v460_v31  ;;  %v463_v32 = vsel %vm457_vm4, %v461_v29, %v462_v30  ;;  %478 = vst [vmem:[%s259_s11 + $0x20] sm:$0xf] %v462_v30 }
  0xf5   : > { %474 = vst [vmem:[%s259_s11 + $0x8] sm:$0xff] %v463_v32 }
  0xf6 PF: > { %s15_s17 = sadd.s32 1, %s695_s17   ;;  %s788_s15 = smov %s691_s16 }
  0xf7   : > { %p12_p5 = scmp.ge.s32.totalorder %s15_s17, 4   ;;  %s789_s16 = smov %s791_s18 }
  0xf9   :  { %14 = sbr.rel (!%p12_p5) target bundleno = 2 (0x2), region = 74 }

</bundles_post_ra>
